<compile_context>
chip_gen: v7x
topology: tpu7x:2x2x1
jax: 0.10.0
libtpu: 0.0.40
codegen_flags: <defaults>
</compile_context>

<pallas_src>
import functools

import jax
import jax.numpy as jnp
from jax.experimental import pallas as pl
from jax.experimental.pallas import tpu as pltpu

EPS = 1e-5


# ---------------------------------------------------------------------------
# Pallas kernel: tiled (patches @ W') + shift [+ shortcut] [+ ReLU]
# ---------------------------------------------------------------------------
def _conv_bn_kernel(*refs, fuse_proj, has_res, apply_relu):
    if fuse_proj:
        p_ref, w_ref, shift_ref, psc_ref, wsc_ref, o_ref, acc_ref = refs
    elif has_res:
        p_ref, w_ref, shift_ref, res_ref, o_ref, acc_ref = refs
    else:
        p_ref, w_ref, shift_ref, o_ref, acc_ref = refs

    k = pl.program_id(2)

    @pl.when(k == 0)
    def _():
        if fuse_proj:
            # Initialize the accumulator with the fused 1x1 projection-shortcut
            # matmul (BN scale pre-folded into wsc) instead of zeros: no tm*tn
            # zero fill, and the projection matmul overlaps the first main-K
            # DMA instead of extending the finalize path.
            acc_ref[...] = jnp.dot(psc_ref[...], wsc_ref[...],
                                   preferred_element_type=jnp.float32)
        else:
            acc_ref[...] = jnp.zeros_like(acc_ref)

    # bf16 x bf16 -> f32 accumulate on the MXU.
    acc_ref[...] += jnp.dot(p_ref[...], w_ref[...],
                            preferred_element_type=jnp.float32)

    @pl.when(k == pl.num_programs(2) - 1)
    def _():
        acc = acc_ref[...] + shift_ref[...]
        if has_res:
            acc = acc + res_ref[...].astype(jnp.float32)
        if apply_relu:
            acc = jnp.maximum(acc, 0.0)
        o_ref[...] = acc.astype(o_ref.dtype)


# ---------------------------------------------------------------------------
# Hardware / tiling helpers
# ---------------------------------------------------------------------------
def _round_up(x, m):
    return ((x + m - 1) // m) * m


def _vmem_capacity():
    """Physical VMEM bytes of this chip (fallback: v7x's 64 MiB per TC)."""
    try:
        cap = int(pltpu.get_tpu_info().vmem_capacity_bytes)
        if (16 << 20) <= cap <= (1 << 30):
            return cap
    except Exception:
        pass
    return 64 << 20


_BUFFERED_OK = None


def _buffered_supported():
    """Probe once whether BlockSpec(pipeline_mode=pl.Buffered(3)) works here."""
    global _BUFFERED_OK
    if _BUFFERED_OK is not None:
        return _BUFFERED_OK
    try:
        def kern(x_ref, o_ref, acc_ref):
            kk = pl.program_id(2)

            @pl.when(kk == 0)
            def _():
                acc_ref[...] = jnp.zeros_like(acc_ref)

            acc_ref[...] += x_ref[...]

            @pl.when(kk == pl.num_programs(2) - 1)
            def _():
                o_ref[...] = acc_ref[...]

        x = jnp.ones((16, 512), jnp.float32)
        y = pl.pallas_call(
            kern,
            out_shape=jax.ShapeDtypeStruct((16, 128), jnp.float32),
            grid_spec=pltpu.PrefetchScalarGridSpec(
                num_scalar_prefetch=0,
                grid=(2, 1, 4),
                in_specs=[pl.BlockSpec((8, 128), lambda i, j, k: (i, k),
                                       pipeline_mode=pl.Buffered(3))],
                out_specs=pl.BlockSpec((8, 128), lambda i, j, k: (i, j)),
                scratch_shapes=[pltpu.VMEM((8, 128), jnp.float32)],
            ),
            compiler_params=pltpu.CompilerParams(
                dimension_semantics=("parallel", "parallel", "arbitrary")),
        )(x)
        _BUFFERED_OK = bool(jnp.allclose(jax.block_until_ready(y), 4.0))
    except Exception:
        _BUFFERED_OK = False
    return _BUFFERED_OK


def _pick_tiles(M, K, Cp, *, out_itemsize, row_extra_bytes, fixed_extra_bytes,
                budget):
    """VMEM-aware tile selection.  K and Cp must be multiples of 128."""
    assert K % 128 == 0 and Cp % 128 == 0
    # tn: full (padded) Cout whenever it fits (<= 512) so gn == 1 and the
    # dominant patch stream is read from HBM exactly once.
    if Cp <= 512:
        tn = Cp
    elif Cp % 256 == 0:
        tn = 256
    else:
        tn = 128
    # tk: largest multiple of 128 dividing K (lane-dense, no partial K blocks).
    tk = 128
    for cand in range(min(K, 1024), 127, -128):
        if K % cand == 0:
            tk = cand
            break

    def vmem_need(tm):
        return (3 * tm * tk * 2                 # patch stream (bf16, <=3 bufs)
                + 2 * tk * tn * 2               # folded weights (bf16, 2 bufs)
                + 2 * tm * tn * out_itemsize    # output tile (2 bufs)
                + tm * tn * 4                   # f32 accumulator scratch
                + 2 * tm * row_extra_bytes      # residual / shortcut stream
                + fixed_extra_bytes
                + 2 * tn * 4)                   # BN shift

    if M < 8:
        tm = M
    else:
        tm = 8
        for cand in (2048, 1024, 512, 256, 128, 64, 32, 16, 8):
            if cand > M:
                continue
            if vmem_need(cand) <= budget:
                tm = cand
                break
    # v7x has 2 TensorCores: keep >= 2 programs on the parallel axes so
    # megacore sharding can engage.
    if pl.cdiv(M, tm) * pl.cdiv(Cp, tn) == 1 and M >= 16:
        tm = max(8, _round_up(pl.cdiv(M, 2), 8))
    return tm, tn, tk, vmem_need(tm)


# ---------------------------------------------------------------------------
# Fused conv (as matmul) + BN (+ shortcut) (+ ReLU) wrapper
# ---------------------------------------------------------------------------
def fused_conv_bn(patches, w_mat, scale, shift, *, residual=None, proj=None,
                  relu=True, out_dtype=jnp.bfloat16):
    """act(patches @ (w*scale) + shift [+ residual | + psc @ (wsc*ssc) + shsc]).

    Returns (M, Cp) with Cout padded up to a multiple of 128 so the kernel's
    output store is lane-dense; the caller slices channels once at the end.
    """
    M, K = patches.shape
    Cout = w_mat.shape[1]
    Cp = _round_up(Cout, 128)

    # Patches may be lane-padded along K; add matching zero rows to weights.
    if w_mat.shape[0] < K:
        w_mat = jnp.pad(w_mat, ((0, K - w_mat.shape[0]), (0, 0)))

    # Fold BN scale into weights, pad Cout to Cp, cast to bf16 for the MXU.
    w_f = w_mat.astype(jnp.float32) * scale.astype(jnp.float32)[None, :]
    w_b = jnp.pad(w_f, ((0, 0), (0, Cp - Cout))).astype(jnp.bfloat16)
    shift_p = jnp.pad(shift.astype(jnp.float32), (0, Cp - Cout))

    fuse_proj = proj is not None
    has_res = residual is not None
    assert not (fuse_proj and has_res)

    extra_args = []
    row_extra = 0
    fixed_extra = 0
    cin_sc = 0
    if fuse_proj:
        psc, wsc, ssc, shsc = proj
        cin_sc = psc.shape[1]
        wsc_f = wsc.astype(jnp.float32) * ssc.astype(jnp.float32)[None, :]
        wsc_b = jnp.pad(wsc_f, ((0, 0), (0, Cp - Cout))).astype(jnp.bfloat16)
        shift_p = shift_p + jnp.pad(shsc.astype(jnp.float32), (0, Cp - Cout))
        extra_args += [psc.astype(jnp.bfloat16), wsc_b]
        row_extra = cin_sc * 2
        fixed_extra = 2 * cin_sc * Cp * 2
    if has_res:
        rc = residual.shape[1]
        extra_args += [jnp.pad(residual.astype(jnp.bfloat16),
                               ((0, 0), (0, Cp - rc)))]
        row_extra = Cp * 2

    shift2 = shift_p.reshape(1, Cp)
    patches_b = patches.astype(jnp.bfloat16)

    capacity = _vmem_capacity()
    out_itemsize = jnp.dtype(out_dtype).itemsize
    tm, tn, tk, need = _pick_tiles(
        M, K, Cp, out_itemsize=out_itemsize, row_extra_bytes=row_extra,
        fixed_extra_bytes=fixed_extra, budget=capacity // 2)
    gm, gn, gk = pl.cdiv(M, tm), pl.cdiv(Cp, tn), K // tk

    # 3-deep buffering on the dominant (HBM-bound) patch stream when the
    # reduction actually has > 1 step and the installed JAX supports it.
    patch_idx = lambda i, j, k: (i, k)
    if gk >= 2 and _buffered_supported():
        patches_spec = pl.BlockSpec((tm, tk), patch_idx,
                                    pipeline_mode=pl.Buffered(3))
    else:
        patches_spec = pl.BlockSpec((tm, tk), patch_idx)

    in_specs = [
        patches_spec,                                     # im2col patches
        pl.BlockSpec((tk, tn), lambda i, j, k: (k, j)),   # folded weights
        pl.BlockSpec((1, tn), lambda i, j, k: (0, j)),    # BN shift
    ]
    if fuse_proj:
        in_specs += [
            pl.BlockSpec((tm, cin_sc), lambda i, j, k: (i, 0)),  # shortcut in
            pl.BlockSpec((cin_sc, tn), lambda i, j, k: (0, j)),  # shortcut w
        ]
    if has_res:
        in_specs += [pl.BlockSpec((tm, tn), lambda i, j, k: (i, j))]

    # Generous VMEM limit on 128 MiB parts (v5e/v6e), clamped to ~85% of this
    # chip's capacity so it also fits v7x's 64 MiB.
    vmem_limit = int(min(int(0.85 * capacity), max(2 * need, 32 << 20)))
    vmem_limit = max(vmem_limit, need + (2 << 20))

    kernel = functools.partial(_conv_bn_kernel, fuse_proj=fuse_proj,
                               has_res=has_res, apply_relu=relu)

    out = pl.pallas_call(
        kernel,
        out_shape=jax.ShapeDtypeStruct((M, Cp), out_dtype),
        grid_spec=pltpu.PrefetchScalarGridSpec(
            num_scalar_prefetch=0,
            grid=(gm, gn, gk),
            in_specs=in_specs,
            out_specs=pl.BlockSpec((tm, tn), lambda i, j, k: (i, j)),
            scratch_shapes=[pltpu.VMEM((tm, tn), jnp.float32)],
        ),
        compiler_params=pltpu.CompilerParams(
            dimension_semantics=("parallel", "parallel", "arbitrary"),
            vmem_limit_bytes=vmem_limit,
        ),
    )(patches_b, w_b, shift2, *extra_args)
    return out  # (M, Cp): channels padded, sliced once by the caller.


# ---------------------------------------------------------------------------
# Glue: im2col (data movement), BN folding, weight reshaping
# ---------------------------------------------------------------------------
def im2col(x, k, stride, pad):
    """(N,H,W,C) -> (N*Ho*Wo, Kp) patches, Kp = round_up(k*k*C, 128).

    The K axis is zero-padded to a multiple of 128 so reduction blocks are
    lane-dense and K % tk == 0 always holds (fused_conv_bn adds matching zero
    rows to the weight matrix).
    """
    N, H, W, C = x.shape
    xp = jnp.pad(x, ((0, 0), (pad, pad), (pad, pad), (0, 0)))
    Ho = (H + 2 * pad - k) // stride + 1
    Wo = (W + 2 * pad - k) // stride + 1
    cols = [xp[:, di:di + stride * Ho:stride, dj:dj + stride * Wo:stride, :]
            for di in range(k) for dj in range(k)]
    K = k * k * C
    Kp = _round_up(K, 128)
    if Kp > K:
        cols.append(jnp.zeros((N, Ho, Wo, Kp - K), x.dtype))
    patches = jnp.concatenate(cols, axis=-1)  # (N, Ho, Wo, Kp)
    return patches.reshape(N * Ho * Wo, Kp), (N, Ho, Wo)


def _fold_bn(gamma, beta, mean, var):
    scale = gamma / jnp.sqrt(var + EPS)
    return scale, beta - mean * scale


def _torch_w_to_mat(w_torch):
    # (Cout, Cin, kh, kw) -> (kh*kw*Cin, Cout), matching im2col (di, dj, c).
    Cout = w_torch.shape[0]
    return jnp.transpose(w_torch, (2, 3, 1, 0)).reshape(-1, Cout)


def basic_block_forward(x_nchw, params, stride):
    """Pallas implementation of BasicBlock.forward. Input/output NCHW f32."""
    x = jnp.transpose(x_nchw, (0, 2, 3, 1)).astype(jnp.bfloat16)  # -> NHWC
    N, H, W, Cin = x.shape
    Cout = params["w1"].shape[0]
    Cp = _round_up(Cout, 128)

    # conv1 (3x3, stride) + BN1 + ReLU  (bf16, channel-padded output)
    p1, (_, Ho, Wo) = im2col(x, 3, stride, 1)
    s1, sh1 = _fold_bn(*params["bn1"])
    y1 = fused_conv_bn(p1, _torch_w_to_mat(params["w1"]), s1, sh1,
                       relu=True, out_dtype=jnp.bfloat16)
    y1_img = y1.reshape(N, Ho, Wo, Cp)

    # conv2 (3x3, stride 1) + BN2 + shortcut + ReLU  (fully fused kernel).
    # The channel slice fuses into the patch-building copy (no standalone
    # HBM round trip); it is a no-op when Cp == Cout.
    p2, _ = im2col(y1_img[..., :Cout], 3, 1, 1)
    s2, sh2 = _fold_bn(*params["bn2"])
    if stride != 1 or Cin != Cout:
        psc = x[:, ::stride, ::stride, :].reshape(N * Ho * Wo, Cin)
        ssc, shsc = _fold_bn(*params["bnsc"])
        out = fused_conv_bn(p2, _torch_w_to_mat(params["w2"]), s2, sh2,
                            proj=(psc, _torch_w_to_mat(params["wsc"]), ssc, shsc),
                            relu=True, out_dtype=jnp.bfloat16)
    else:
        res = x.reshape(N * H * W, Cin)
        out = fused_conv_bn(p2, _torch_w_to_mat(params["w2"]), s2, sh2,
                            residual=res, relu=True, out_dtype=jnp.bfloat16)

    # Single channel-slice + layout change + upcast, fused by XLA.
    out = out.reshape(N, Ho, Wo, Cp)[..., :Cout]
    return jnp.transpose(out, (0, 3, 1, 2)).astype(jnp.float32)  # NHWC -> NCHW


# ---------------------------------------------------------------------------
# Pure-JAX f32 reference (correctness check)
# ---------------------------------------------------------------------------
def _ref_conv(x_nhwc, w_torch, stride, pad):
    w = jnp.transpose(w_torch, (2, 3, 1, 0))  # HWIO
    return jax.lax.conv_general_dilated(
        x_nhwc, w, (stride, stride), [(pad, pad), (pad, pad)],
        dimension_numbers=("NHWC", "HWIO", "NHWC"),
    )


def _ref_bn(x, gamma, beta, mean, var):
    return (x - mean) / jnp.sqrt(var + EPS) * gamma + beta


def reference_block(x_nchw, params, stride):
    x = jnp.transpose(x_nchw, (0, 2, 3, 1))
    Cin = x.shape[-1]
    Cout = params["w1"].shape[0]
    out = jax.nn.relu(_ref_bn(_ref_conv(x, params["w1"], stride, 1), *params["bn1"]))
    out = _ref_bn(_ref_conv(out, params["w2"], 1, 1), *params["bn2"])
    if stride != 1 or Cin != Cout:
        sc = _ref_bn(_ref_conv(x, params["wsc"], stride, 0), *params["bnsc"])
    else:
        sc = x
    out = jax.nn.relu(out + sc)
    return jnp.transpose(out, (0, 3, 1, 2))


# ---------------------------------------------------------------------------
def make_params(key, in_channels, out_channels):
    ks = jax.random.split(key, 6)

    def bn_params(k, c):
        k0, k1, k2, k3 = jax.random.split(k, 4)
        gamma = jax.random.uniform(k0, (c,), jnp.float32, 0.5, 1.5)
        beta = 0.1 * jax.random.normal(k1, (c,), jnp.float32)
        mean = 0.1 * jax.random.normal(k2, (c,), jnp.float32)
        var = jax.random.uniform(k3, (c,), jnp.float32, 0.5, 1.5)
        return (gamma, beta, mean, var)

    return {
        "w1": 0.1 * jax.random.normal(ks[0], (out_channels, in_channels, 3, 3), jnp.float32),
        "bn1": bn_params(ks[1], out_channels),
        "w2": 0.1 * jax.random.normal(ks[2], (out_channels, out_channels, 3, 3), jnp.float32),
        "bn2": bn_params(ks[3], out_channels),
        "wsc": 0.1 * jax.random.normal(ks[4], (out_channels, in_channels, 1, 1), jnp.float32),
        "bnsc": bn_params(ks[5], out_channels),
    }


if __name__ == "__main__":
    key = jax.random.PRNGKey(0)

    configs = [
        # projection shortcut (stride 2), exact-multiple M
        dict(N=2, Cin=4, H=16, W=16, Cout=8, stride=2),
        # identity shortcut, partial last M block (M=200, tm=128)
        dict(N=2, Cin=8, H=10, W=10, Cout=8, stride=1),
        # projection shortcut (1x1 stride 1), multi-step K reduction (gk>1)
        # and partial last M block (M=36, tm=32)
        dict(N=1, Cin=128, H=6, W=6, Cout=32, stride=1),
    ]

    for cfg in configs:
        kx, kp, key = jax.random.split(key, 3)
        x = jax.random.normal(kx, (cfg["N"], cfg["Cin"], cfg["H"], cfg["W"]),
                              jnp.float32)
        params = make_params(kp, cfg["Cin"], cfg["Cout"])

        out = jax.block_until_ready(basic_block_forward(x, params, cfg["stride"]))
        ref = jax.block_until_ready(reference_block(x, params, cfg["stride"]))

        Ho = (cfg["H"] - 1) // cfg["stride"] + 1
        assert out.shape == (cfg["N"], cfg["Cout"], Ho, Ho), out.shape
        # bf16 MXU operands / bf16 intermediates -> relaxed tolerance vs the
        # f32 reference (rounding accumulates over reductions up to K~1.2k).
        max_err = float(jnp.max(jnp.abs(out - ref)))
        assert jnp.allclose(out, ref, rtol=5e-2, atol=1e-1), (cfg, max_err)

    print("KERNEL_OK")
</pallas_src>

<mosaic_0001>
module attributes {stable_mosaic.version = 11 : i64} {
  func.func @_conv_bn_kernel(%arg0: i32, %arg1: i32, %arg2: i32, %arg3: memref<64x128xbf16, #tpu.memory_space<vmem>>, %arg4: memref<128x128xbf16, #tpu.memory_space<vmem>>, %arg5: memref<1x128xf32, #tpu.memory_space<vmem>>, %arg6: memref<64x128xbf16, #tpu.memory_space<vmem>>, %arg7: memref<64x128xf32, #tpu.memory_space<vmem>>) attributes {dimension_semantics = [#tpu.dimension_semantics<parallel>, #tpu.dimension_semantics<parallel>, #tpu.dimension_semantics<arbitrary>], iteration_bounds = array<i64: 2, 1, 1>, scalar_prefetch = 0 : i64, scratch_operands = 1 : i64, tpu.core_type = #tpu.core_type<tc>, window_params = [{transform_indices = @transform_0, window_bounds = array<i64: 64, 128>}, {transform_indices = @transform_1, window_bounds = array<i64: 128, 128>}, {transform_indices = @transform_2, window_bounds = array<i64: 1, 128>}, {transform_indices = @transform_3, window_bounds = array<i64: 64, 128>}]} {
    %c0_i32 = arith.constant 0 : i32
    %0 = arith.cmpi eq, %arg2, %c0_i32 : i32
    %1 = arith.extui %0 : i1 to i32
    %c0_i32_0 = arith.constant 0 : i32
    %2 = arith.cmpi ne, %1, %c0_i32_0 : i32
    scf.if %2 {
      %cst_10 = arith.constant 0.000000e+00 : f32
      %12 = vector.broadcast %cst_10 : f32 to vector<64x128xf32>
      %c0_11 = arith.constant 0 : index
      %c0_12 = arith.constant 0 : index
      %13 = vector.load %arg7[%c0_11, %c0_12] : memref<64x128xf32, #tpu.memory_space<vmem>>, vector<64x128xf32>
      tpu.vector_store %arg7[%c0_11, %c0_12], %12 {strides = array<i32>} : memref<64x128xf32, #tpu.memory_space<vmem>>, vector<64x128xf32>,
    } else {
    }
    %c0 = arith.constant 0 : index
    %c0_1 = arith.constant 0 : index
    %3 = vector.load %arg7[%c0, %c0_1] : memref<64x128xf32, #tpu.memory_space<vmem>>, vector<64x128xf32>
    %c0_2 = arith.constant 0 : index
    %c0_3 = arith.constant 0 : index
    %4 = vector.load %arg3[%c0_2, %c0_3] : memref<64x128xbf16, #tpu.memory_space<vmem>>, vector<64x128xbf16>
    %c0_4 = arith.constant 0 : index
    %c0_5 = arith.constant 0 : index
    %5 = vector.load %arg4[%c0_4, %c0_5] : memref<128x128xbf16, #tpu.memory_space<vmem>>, vector<128x128xbf16>
    %cst = arith.constant dense<0.000000e+00> : vector<64x128xf32>
    %6 = tpu.matmul %4, %5, %cst {dimension_numbers = #tpu.dot_dimension_numbers<[1], [0], [0], [1], [0, 0, 1, 1], [], []>} : vector<64x128xbf16>, vector<128x128xbf16>, vector<64x128xf32> -> vector<64x128xf32>
    %7 = arith.addf %3, %6 : vector<64x128xf32>
    %c0_6 = arith.constant 0 : index
    %c0_7 = arith.constant 0 : index
    %8 = vector.load %arg7[%c0_6, %c0_7] : memref<64x128xf32, #tpu.memory_space<vmem>>, vector<64x128xf32>
    tpu.vector_store %arg7[%c0_6, %c0_7], %7 {strides = array<i32>} : memref<64x128xf32, #tpu.memory_space<vmem>>, vector<64x128xf32>,
    %c0_i32_8 = arith.constant 0 : i32
    %9 = arith.cmpi eq, %arg2, %c0_i32_8 : i32
    %10 = arith.extui %9 : i1 to i32
    %c0_i32_9 = arith.constant 0 : i32
    %11 = arith.cmpi ne, %10, %c0_i32_9 : i32
    scf.if %11 {
      %c0_10 = arith.constant 0 : index
      %c0_11 = arith.constant 0 : index
      %12 = vector.load %arg7[%c0_10, %c0_11] : memref<64x128xf32, #tpu.memory_space<vmem>>, vector<64x128xf32>
      %c0_12 = arith.constant 0 : index
      %c0_13 = arith.constant 0 : index
      %13 = vector.load %arg5[%c0_12, %c0_13] : memref<1x128xf32, #tpu.memory_space<vmem>>, vector<1x128xf32>
      %14 = vector.broadcast %13 : vector<1x128xf32> to vector<64x128xf32>
      %15 = arith.addf %12, %14 : vector<64x128xf32>
      %cst_14 = arith.constant 0.000000e+00 : f32
      %16 = vector.broadcast %cst_14 : f32 to vector<64x128xf32>
      %17 = arith.maximumf %15, %16 : vector<64x128xf32>
      %18 = arith.truncf %17 : vector<64x128xf32> to vector<64x128xbf16>
      %c0_15 = arith.constant 0 : index
      %c0_16 = arith.constant 0 : index
      %19 = vector.load %arg6[%c0_15, %c0_16] : memref<64x128xbf16, #tpu.memory_space<vmem>>, vector<64x128xbf16>
      tpu.vector_store %arg6[%c0_15, %c0_16], %18 {strides = array<i32>} : memref<64x128xbf16, #tpu.memory_space<vmem>>, vector<64x128xbf16>,
    } else {
    }
    return
  }
  func.func @transform_0(%arg0: i32, %arg1: i32, %arg2: i32) -> (i32, i32) {
    %c0_i32 = arith.constant 0 : i32
    return %arg0, %arg2 : i32, i32
  }
  func.func @transform_1(%arg0: i32, %arg1: i32, %arg2: i32) -> (i32, i32) {
    %c0_i32 = arith.constant 0 : i32
    return %arg2, %arg1 : i32, i32
  }
  func.func @transform_2(%arg0: i32, %arg1: i32, %arg2: i32) -> (i32, i32) {
    %c0_i32 = arith.constant 0 : i32
    %c0_i32_0 = arith.constant 0 : i32
    return %c0_i32, %arg1 : i32, i32
  }
  func.func @transform_3(%arg0: i32, %arg1: i32, %arg2: i32) -> (i32, i32) {
    %c0_i32 = arith.constant 0 : i32
    return %arg0, %arg1 : i32, i32
  }
}

</mosaic_0001>

<bundles_post_ra>
// kernel: tpu_custom_call.1
= control target key start
LH: loop header
LB: loop body
LE: loop exit
PB: predicated region body
PF: predicated region fallthrough
CT: control target
= control target key end

     0   :  { %8 = vsyncpa [#allocation4], 0  ;;  %s1281_s0 = inlined_call_operand.hbm [shape: bf16[128,128], index: 0, kind: input, shape index: {}]   ;;  %s1282_s1 = inlined_call_operand.hbm [shape: bf16[128,128], index: 1, kind: input, shape index: {}]   ;;  %s1283_s2 = inlined_call_operand.vmem [shape: f32[1,128], index: 2, kind: input, shape index: {}]   ;;  %s1284_s3 = inlined_call_operand.hbm [shape: bf16[128,128], index: 3, kind: output, shape index: {}]  }
   0x1   :  { %10 = vsyncpa [#allocation4 + $0x1], 0 }
   0x2   :  { %11 = vsyncpa [#allocation7], 0 }
   0x3   :  { %12 = vsyncpa [#allocation5], 0 }
   0x4   :  { %14 = vsyncpa [#allocation5 + $0x1], 0  ;;  %s1043_s12 = smov 0   ;;  %s1045_s13 = smov 0  }
   0x5   :  { %s1047_s14 = smov 0   ;;  %s1049_s15 = smov 0  }
   0x6   :  { %s1051_s16 = smov 0   ;;  %s1053_s17 = smov 0  }
   0x7 LB: > { %s657_s18 = sadd.s32 4294967295, %s1014_s17   ;;  %s658_s19 = sadd.s32 4294967294, %s1014_s17   ;;  %s1014_s17 = sphi %s1053_s17, %s20_s17   ;;  %s1010_s16 = sphi %s1051_s16, %s1308_s16   ;;  %s1006_s15 = sphi %s1049_s15, %s1307_s15   ;;  %s1002_s14 = sphi %s1047_s14, %s1306_s14   ;;  %s998_s13 = sphi %s1045_s13, %s1305_s13   ;;  %s994_s12 = sphi %s1043_s12, %s1304_s12  }
   0x8   : > { %p61_p0 = scmp.ne.s32.totalorder %s998_s13, %s994_s12  ;;  %p1077_p1 = scmp.eq.s32.totalorder %s657_s18, 0 }
   0x9   : > { %p1081_p2 = scmp.eq.s32.totalorder %s657_s18, 1  ;;  %p147_p3 = scmp.eq.s32.totalorder %s658_s19, 1 }
   0xa   : > { %s1289_s20 = scalar_select %p1077_p1, 1, 0 }
   0xb   : > { %s1290_s21 = scalar_select %p1081_p2, 1, 0 }
   0xc   : > { %p1087_p4 = por %p1077_p1, %p61_p0  ;;  %p659_p5 = scmp.ge.s32.totalorder %s1014_s17, 1 }
   0xd   : > { %p1092_p6 = por %p147_p3, %p61_p0  ;;  %p154_p7 = scmp.lt.s32.totalorder %s1014_s17, 3 }
   0xe   : > { %s1291_s22 = scalar_select %p1087_p4, 1, 0 }
   0xf   : > { %s1292_s23 = scalar_select %p1092_p6, 1, 0 }
  0x10   : > { %p1097_p8 = pnand %p659_p5, %p154_p7  ;;  %s1016_s25 = smov [#allocation6]  }
  0x11   : > { %s170_s26 = sshll.u32 %s1016_s25, 4  ;;  %s39_s28 = sadd.s32 1, %s1010_s16  ;;  %s171_s26 = int_to_ptr.vmem [resolvable:$true] %s170_s26 }
  0x12   : > { %s1293_s24 = scalar_select %p1097_p8, 1, 0 }
  0x13   : > { %p789_p9 = pneg %p1097_p8  ;;  %s870_s4 = scalar_lea.hbm %s1282_s1, 1024 }
  0x14   : > { %p871_p12 = scmp.ne.s32.totalorder %s1282_s1, %s870_s4  ;;  %p877_p5 = scmp.lt.u32.totalorder %s870_s4, %s1282_s1 }
  0x15   : > { %p1106_p11 = pnand %p789_p9, %p1077_p1 }
  0x17   : > { %p872_p13 = pneg %p1106_p11 }
  0x19   : > { %p873_p0 = pnand %p872_p13, %p871_p12 }
  0x1b   : > { %p874_p3 = pneg %p873_p0 }
  0x1d   : > { %p879_p7 = pnand %p877_p5, %p874_p3 }
  0x1f   : > { %882 = shalt.err (!%p879_p7)
}
  0x20   : > { %s883_s9 = scalar_lea.vmem %s171_s26, 1024  ;;  %p891_p1 = scmp.lt.s32.totalorder %s171_s26, %s171_s26 }
  0x21   : > { %p884_p9 = scmp.ne.s32.totalorder %s171_s26, %s883_s9  ;;  %p892_p4 = scmp.lt.s32.totalorder %s883_s9, %s883_s9 }
  0x23   : > { %p886_p10 = pnand %p884_p9, %p872_p13  ;;  %p893_p8 = por %p892_p4, %p891_p1 }
  0x25   : > { %p887_p6 = pneg %p886_p10 }
  0x27   : > { %p894_p2 = pnand %p893_p8, %p887_p6 }
  0x29   : > { %897 = shalt.err (!%p894_p2)
}
  0x2a   : > { %s1017_s10 = smov 64   ;;  %s1018_s11 = smov 4  }
  0x2b   : > { %792 = dma.hbm_to_vmem [thread:$0]  (!%p1106_p11), %s1282_s1, 1024, %s171_s26, [#allocation7], %s1017_s10, %s1017_s10, %s1018_s11  }
  0x2c   : > { %p41_p1 = scmp.ge.s32.totalorder %s39_s28, 2  ;;  %s48_s25 = sadd.s32 1, %s1002_s14 }
  0x2d   : > { %p55_p2 = scmp.ne.s32.totalorder %s1002_s14, %s998_s13  ;;  %p56_p4 = scmp.eq.s32.totalorder %s1014_s17, 0 }
  0x2e   : > { %s1310_s28 = smov (%p41_p1, %s39_s28), 0  ;;  %p1296_p8 = scmp.ne.s32.totalorder %s1290_s21, 0 }
  0x2f   : > { %p1136_p6 = por %p56_p4, %p55_p2  ;;  %s43_s30 = ssub.s32 %s1010_s16, %s1310_s28 }
  0x30   : > { %p1142_p10 = por %p1296_p8, %p55_p2  ;;  %p802_p12 = scmp.lt.s32.totalorder %s1014_s17, 2 }
  0x31   : > { %p46_p11 = scmp.eq.s32.totalorder %s43_s30, 0  ;;  %s190_s26 = sand.u32 1, %s1002_s14  }
  0x32   : > { %s663_s4 = sshll.u32 %s190_s26, 5  ;;  %s696_s6 = sshll.u32 %s1010_s16, 9 }
  0x33   : > { %s1151_s5 = scalar_select %p46_p11, %s1002_s14, %s48_s25  }
  0x34   : > { %s1157_s9 = scalar_lea.hbm %s1281_s0, %s696_s6  ;;  %s194_s21 = scalar_lea.vmem [#allocation3], %s663_s4 }
  0x35   : > { %s202_s18 = sshll.u32 %s194_s21, 4  ;;  %p1163_p13 = pnand %p802_p12, %p1136_p6  ;;  %s1159_s18 = int_to_ptr.vmem [resolvable:$true] %s202_s18 }
  0x36   : > { %s1167_s25 = scalar_lea.sflag [#allocation4], %s190_s26  ;;  %s898_s30 = scalar_lea.hbm %s1157_s9, 512 }
  0x37   : > { %p899_p0 = scmp.ne.s32.totalorder %s1157_s9, %s898_s30  ;;  %p900_p3 = pneg %p1163_p13 }
  0x38   : > { %s903_s29 = scalar_lea.hbm %s1281_s0, 1024  ;;  %p904_p9 = scmp.lt.u32.totalorder %s1157_s9, %s1281_s0 }
  0x39   : > { %p901_p5 = pnand %p900_p3, %p899_p0  ;;  %p905_p1 = scmp.lt.u32.totalorder %s903_s29, %s898_s30 }
  0x3a   : > { %p907_p4 = scmp.lt.u32.totalorder %s898_s30, %s1157_s9 }
  0x3b   : > { %p902_p7 = pneg %p901_p5  ;;  %p906_p2 = por %p905_p1, %p904_p9 }
  0x3d   : > { %p908_p6 = por %p907_p4, %p906_p2 }
  0x3f   : > { %p909_p8 = pnand %p908_p6, %p902_p7 }
  0x41   : > { %912 = shalt.err (!%p909_p8)
}
  0x42   : > { %s913_s26 = scalar_lea.vmem %s1159_s18, 512  ;;  %s1019_s21 = smov [#allocation3]  }
  0x43   : > { %p914_p12 = scmp.ne.s32.totalorder %s1159_s18, %s913_s26  ;;  %s918_s4 = sshll.u32 %s1019_s21, 4  ;;  %s919_s4 = int_to_ptr.vmem [resolvable:$false] %s918_s4 }
  0x44   : > { %s920_s6 = scalar_lea.vmem %s919_s4, 1024  ;;  %p921_p5 = scmp.lt.s32.totalorder %s1159_s18, %s919_s4 }
  0x45   : > { %p916_p11 = pnand %p914_p12, %p900_p3  ;;  %p922_p9 = scmp.lt.s32.totalorder %s920_s6, %s913_s26 }
  0x47   : > { %p917_p0 = pneg %p916_p11  ;;  %p923_p1 = por %p922_p9, %p921_p5 }
  0x49   : > { %p924_p2 = pnand %p923_p1, %p917_p0 }
  0x4b   : > { %927 = shalt.err (!%p924_p2)
}
  0x4c   : > { %796 = dma.hbm_to_vmem [thread:$0]  (!%p1163_p13), %s1157_s9, 512, %s1159_s18, %s1167_s25, %s1017_s10, %s1017_s10, %s1018_s11  }
  0x4d   : > { %p1299_p3 = scmp.ne.s32.totalorder %s1293_s24, 0 }
  0x4e   : > { %s1201_s30 = sand.u32 (!%p1299_p3), 1, %s998_s13   ;;  %p1300_p7 = scmp.ne.s32.totalorder (!%p1299_p3), %s1291_s22, 0 }
  0x4f   : > { %214 = sbr.rel (%p1299_p3) target bundleno = 359 (0x167), region = 32  ;;  %s667_s29 = sshll.u32 (!%p1299_p3), %s1201_s30, 5 }
  0x50   : > { %s217_s7 = scalar_lea.sflag (!%p1299_p3), [#allocation4], %s1201_s30  ;;  %s1207_s19 = scalar_lea.vmem (!%p1299_p3), [#allocation3], %s667_s29 }
  0x56   : > { %981 = dma.done.wait (%p1300_p7), %s217_s7, 512  }
  0x57   : > { %983 = vsyncadd (%p1300_p7), %s217_s7, 4294966784  ;;  %p1301_p13 = scmp.ne.s32.totalorder %s1289_s20, 0 }
  0x59   : > { %985 = dma.done.wait (%p1301_p13), [#allocation7], 1024  }
  0x5a   : > { %987 = vsyncadd (%p1301_p13), [#allocation7], 4294966272  ;;  %v858_v0 = vld [vmem:[#allocation6] sm:$0xff]   ;;  %v859_v1 = vld [vmem:[#allocation6 + $0x8] sm:$0xff]   ;;  %s249_s24 = scalar_lea.vmem [#allocation8], %s667_s29  ;;  %s705_s11 = sshll.u32 %s1006_s15, 9 }
  0x5b   : > { %741 = vmatprep.subr.bf16.mxu0 %v858_v0  ;;  %765 = vmatprep.subr.bf16.mxu1 %v858_v0  ;;  %v860_v2 = vld [vmem:[#allocation6 + $0x10] sm:$0xff]   ;;  %v861_v3 = vld [vmem:[#allocation6 + $0x18] sm:$0xff]   ;;  %v866_v4 = vld [vmem:[%s1207_s19] sm:$0xff]   ;;  %s543_s10 = sshll.u32 %s249_s24, 4  ;;  %s1232_s15 = scalar_lea.hbm %s1284_s3, %s705_s11  ;;  %s1227_s10 = int_to_ptr.vmem [resolvable:$true] %s543_s10 }
  0x5c   : > { %742 = vmatpush3.bf16.msra.mxu0 %v858_v0  ;;  %773 = vmatpush3.bf16.msra.mxu1 %v858_v0  ;;  %v867_v5 = vld [vmem:[%s1207_s19 + $0x10] sm:$0xff]   ;;  %v862_v6 = vld [vmem:[#allocation6 + $0x20] sm:$0xff]   ;;  %v863_v7 = vld [vmem:[#allocation6 + $0x28] sm:$0xff]   ;;  %s529_s25 = scalar_lea.sflag [#allocation5], %s1201_s30  ;;  %s928_s8 = scalar_lea.vmem %s1227_s10, 512 }
  0x5d   : > { %743 = vmatprep.subr.bf16.mxu0 %v859_v1  ;;  %766 = vmatprep.subr.bf16.mxu1 %v859_v1  ;;  %v864_v8 = vld [vmem:[#allocation6 + $0x30] sm:$0xff]   ;;  %v865_v9 = vld [vmem:[#allocation6 + $0x38] sm:$0xff]   ;;  %v868_v10 = vld [vmem:[%s1207_s19 + $0x8] sm:$0xff]   ;;  %p929_p4 = scmp.ne.s32.totalorder %s1227_s10, %s928_s8  ;;  %s1020_s26 = smov [#allocation8]  }
  0x5e   : > { %757 = vmatprep.mubr.bf16.mxu0 %v866_v4  ;;  %761 = vmatprep.mubr.bf16.mxu1 %v867_v5  ;;  %v869_v11 = vld [vmem:[%s1207_s19 + $0x18] sm:$0xff]   ;;  %v682_v12 = vld [vmem:[%s1283_s2] ss:$0 sm:$0xff]  ;;  %s932_s21 = sshll.u32 %s1020_s26, 4  ;;  %s933_s21 = int_to_ptr.vmem [resolvable:$false] %s932_s21 }
  0x5f   : > { %p930_p6 = pnand %p929_p4, %p1142_p10  ;;  %s934_s4 = scalar_lea.vmem %s933_s21, 1024 }
  0x60   : > { %744 = vmatpush3.bf16.msra.mxu0 %v859_v1  ;;  %774 = vmatpush3.bf16.msra.mxu1 %v859_v1  ;;  %p935_p12 = scmp.lt.s32.totalorder %s1227_s10, %s933_s21  ;;  %p936_p11 = scmp.lt.s32.totalorder %s934_s4, %s928_s8 }
  0x61   : > { %745 = vmatprep.subr.bf16.mxu0 %v860_v2  ;;  %767 = vmatprep.subr.bf16.mxu1 %v860_v2  ;;  %p931_p8 = pneg %p930_p6 }
  0x62   : > { %p937_p0 = por %p936_p11, %p935_p12 }
  0x64   : > { %746 = vmatpush3.bf16.msra.mxu0 %v860_v2  ;;  %775 = vmatpush3.bf16.msra.mxu1 %v860_v2  ;;  %p938_p5 = pnand %p937_p0, %p931_p8 }
  0x65   : > { %747 = vmatprep.subr.bf16.mxu0 %v861_v3  ;;  %768 = vmatprep.subr.bf16.mxu1 %v861_v3 }
  0x68   : > { %748 = vmatpush3.bf16.msra.mxu0 %v861_v3  ;;  %776 = vmatpush3.bf16.msra.mxu1 %v861_v3 }
  0x69   : > { %749 = vmatprep.subr.bf16.mxu0 %v862_v6  ;;  %769 = vmatprep.subr.bf16.mxu1 %v862_v6 }
  0x6c   : > { %750 = vmatpush3.bf16.msra.mxu0 %v862_v6  ;;  %777 = vmatpush3.bf16.msra.mxu1 %v862_v6 }
  0x6d   : > { %751 = vmatprep.subr.bf16.mxu0 %v863_v7  ;;  %770 = vmatprep.subr.bf16.mxu1 %v863_v7 }
  0x70   : > { %752 = vmatpush3.bf16.msra.mxu0 %v863_v7  ;;  %778 = vmatpush3.bf16.msra.mxu1 %v863_v7 }
  0x71   : > { %753 = vmatprep.subr.bf16.mxu0 %v864_v8  ;;  %771 = vmatprep.subr.bf16.mxu1 %v864_v8 }
  0x74   : > { %754 = vmatpush3.bf16.msra.mxu0 %v864_v8  ;;  %779 = vmatpush3.bf16.msra.mxu1 %v864_v8 }
  0x75   : > { %755 = vmatprep.subr.bf16.mxu0 %v865_v9  ;;  %772 = vmatprep.subr.bf16.mxu1 %v865_v9 }
  0x78   : > { %756 = vmatpush3.bf16.msra.mxu0 %v865_v9  ;;  %780 = vmatpush3.bf16.msra.mxu1 %v865_v9 }
  0x7b   : > { %758 = vmatmul.mubr.bf16.vlgmr.msra.gmra.mrb[0].mxu0 %v868_v10  ;;  %762 = vmatmul.mubr.bf16.vlgmr.msra.gmra.mrb[0].mxu1 %v869_v11 }
 0x14e   : > { %v759_v13 = vpop.f32.mrb[0].mxu0  ;;  %v763_v14 = vpop.f32.mrb[0].mxu1 }
 0x14f   : > { %v474_v15 = vadd.f32 %v759_v13, %v682_v12  ;;  %v478_v16 = vadd.f32 %v763_v14, %v682_v12  ;;  %v407_v17 = vpop.f32.mrb[1].mxu0  ;;  %v423_v18 = vpop.f32.mrb[1].mxu1 }
 0x150   : > { %v472_v19 = vadd.f32 %v682_v12, %v407_v17  ;;  %v476_v20 = vadd.f32 %v682_v12, %v423_v18  ;;  %v760_v21 = vpop.f32.mrb[2].mxu0  ;;  %v764_v22 = vpop.f32.mrb[2].mxu1 }
 0x151   : > { %v475_v23 = vadd.f32 %v760_v21, %v682_v12  ;;  %v479_v24 = vadd.f32 %v764_v22, %v682_v12  ;;  %v410_v25 = vpop.f32.mrb[3].mxu0  ;;  %v426_v26 = vpop.f32.mrb[3].mxu1  ;;  %v482_v29 = vmax.f32 %v474_v15, 0.0  ;;  %v486_v30 = vmax.f32 %v478_v16, 0.0 }
 0x152   : > { %v473_v27 = vadd.f32 %v682_v12, %v410_v25  ;;  %v477_v28 = vadd.f32 %v682_v12, %v426_v26  ;;  %v480_v33 = vmax.f32 %v472_v19, 0.0  ;;  %v484_v34 = vmax.f32 %v476_v20, 0.0 }
 0x153   : > { %v483_v31 = vmax.f32 %v475_v23, 0.0  ;;  %v487_v32 = vmax.f32 %v479_v24, 0.0 }
 0x154   : > { %v481_v35 = vmax.f32 %v473_v27, 0.0  ;;  %v485_v36 = vmax.f32 %v477_v28, 0.0 }
 0x155   : > { %v714_v37 = vpack.c.bf16 %v483_v31, %v482_v29  ;;  %v724_v38 = vpack.c.bf16 %v487_v32, %v486_v30 }
 0x156   : > { %v709_v39 = vpack.c.bf16 %v481_v35, %v480_v33  ;;  %v719_v40 = vpack.c.bf16 %v485_v36, %v484_v34 }
 0x157   : > { %726 = vst [vmem:[%s249_s24 + $0x8] sm:$0xff] %v714_v37   ;;  %728 = vst [vmem:[%s249_s24 + $0x18] sm:$0xff] %v724_v38  }
 0x158   : > { %710 = vst [vmem:[%s249_s24] sm:$0xff] %v709_v39   ;;  %727 = vst [vmem:[%s249_s24 + $0x10] sm:$0xff] %v719_v40  }
 0x159   : > { %941 = shalt.err (!%p938_p5)
}
 0x15a   : > { %s942_s6 = scalar_lea.hbm %s1232_s15, 512  ;;  %s946_s19 = scalar_lea.hbm %s1284_s3, 1024 }
 0x15b   : > { %p943_p9 = scmp.ne.s32.totalorder %s1232_s15, %s942_s6  ;;  %p947_p3 = scmp.lt.u32.totalorder %s1232_s15, %s1284_s3 }
 0x15c   : > { %p948_p7 = scmp.lt.u32.totalorder %s946_s19, %s942_s6  ;;  %p950_p4 = scmp.lt.u32.totalorder %s942_s6, %s1232_s15 }
 0x15d   : > { %p944_p1 = pnand %p943_p9, %p1142_p10 }
 0x15e   : > { %p949_p13 = por %p948_p7, %p947_p3 }
 0x15f   : > { %p945_p2 = pneg %p944_p1 }
 0x160   : > { %p951_p6 = por %p950_p4, %p949_p13 }
 0x162   : > { %p952_p8 = pnand %p951_p6, %p945_p2 }
 0x164   : > { %955 = shalt.err (!%p952_p8)
}
 0x165   : > { %s1021_s24 = smov 64   ;;  %s1022_s11 = smov 4  }
 0x166   : > { %787 = dma.vmem_to_hbm [thread:$0]  (%p1142_p10), %s1227_s10, 512, %s1232_s15, %s529_s25, %s1021_s24, %s1021_s24, %s1022_s11  }
 0x167 PF: > { %s558_s9 = sand.u32 1, %s994_s12   ;;  %p1302_p12 = scmp.ne.s32.totalorder %s1292_s23, 0 }
 0x168   : > { %p1303_p11 = scmp.ge.s32.totalorder %s1014_s17, 2  ;;  %s559_s18 = scalar_lea.sflag [#allocation5], %s558_s9 }
 0x16a   : > { %p798_p0 = pnand %p1303_p11, %p1302_p12 }
 0x16c   : > { %989 = dma.done.wait (!%p798_p0), %s559_s18, 512  }
 0x16d   : > { %991 = vsyncadd (!%p798_p0), %s559_s18, 4294966784  ;;  %s20_s17 = sadd.s32 1, %s1014_s17   ;;  %s1304_s12 = smov %s998_s13 }
 0x16e   : > { %p17_p5 = scmp.ge.s32.totalorder %s20_s17, 4   ;;  %s1305_s13 = smov %s1002_s14 }
 0x16f   : > { %s1306_s14 = smov %s1151_s5  ;;  %s1307_s15 = smov %s1010_s16 }
 0x170   : > { %s1308_s16 = smov %s1310_s28  ;;  %19 = sbr.rel (!%p17_p5) target bundleno = 7 (0x7), region = 93 }
 0x177   :  { %564 = vsyncpa [#allocation4], 1 }
 0x178   :  { %566 = vsyncpa [#allocation4 + $0x1], 1 }
 0x179   :  { %567 = vsyncpa [#allocation7], 1 }
 0x17a   :  { %568 = vsyncpa [#allocation5], 1 }
 0x17b   :  { %570 = vsyncpa [#allocation5 + $0x1], 1 }

</bundles_post_ra>
